<compile_context>
chip_gen: v7x
topology: tpu7x:2x2x1
jax: 0.10.0
libtpu: 0.0.40
codegen_flags: <defaults>
</compile_context>

<pallas_src>
import functools

import jax
import jax.numpy as jnp
import numpy as np
from jax.experimental import pallas as pl
from jax.experimental.pallas import tpu as pltpu


def _depth_bce_kernel(gt_ref, depth_ref, out_ref, *, d0, dstep, D):
    gt = gt_ref[...].astype(jnp.float32)        # (TB, 1, HW)
    x = depth_ref[...].astype(jnp.float32)      # (TB, D, HW) pre-sigmoid logits

    # Depth-bin index and validity weight per pixel.  Exact division by dstep so the
    # floor() at bin boundaries matches the reference bit-for-bit.
    idx = jnp.clip(jnp.floor((gt - d0) / dstep), 0.0, float(D)).astype(jnp.int32)
    w = (gt != 0.0).astype(jnp.float32)         # (TB, 1, HW)

    # Target selector: bin d is the one-hot target iff d == idx (idx == D matches no bin
    # -> all-zero target).  Tiny (1, D, 1) iota, broadcast compare.
    d_iota = jax.lax.broadcasted_iota(jnp.int32, (1, D, 1), 1)
    is_tgt = d_iota == idx                      # (TB, D, HW)

    # Logit-space BCE: softplus(x) = max(x,0) + log1p(exp(-|x|)) -> 1 exp + 1 log on EUP.
    # Fused select+clamp (saves 1 VALU op and two full-tile temporaries):
    #   target==0: min(softplus(x), 100)           target==1: min(softplus(x) - x, 100)
    sp = jnp.maximum(x, 0.0) + jnp.log1p(jnp.exp(-jnp.abs(x)))
    bce = jnp.minimum(sp - jnp.where(is_tgt, x, 0.0), 100.0)

    # Reduce over depth bins (sublane reduce), apply the validity weight once per pixel,
    # reduce the whole block to a scalar partial sum, and write it lane-dense: the
    # partial lives in lane 0 of a 128-wide row, zeros elsewhere (unmasked vst).
    per_pixel = jnp.sum(bce, axis=1, keepdims=True)          # (TB, 1, HW)
    s = jnp.sum(w * per_pixel)                                # scalar partial

    lane = jax.lax.broadcasted_iota(jnp.int32, out_ref.shape, 2)
    out_ref[...] = jnp.where(lane == 0, s, 0.0)


def _vmem_limit_bytes():
    """Generation-aware scoped-VMEM limit (3/4 of physical, capped at 96 MiB)."""
    cap = 64 * 1024 * 1024                      # conservative fallback: v7x per-core VMEM
    try:
        cap = int(pltpu.get_tpu_info().vmem_capacity_bytes)
    except Exception:                            # noqa: BLE001 - best-effort HW query
        pass
    return min((cap * 3) // 4, 96 * 1024 * 1024)


def _choose_tb(BN, D, HW, depth_bytes, gt_bytes, vmem_limit_bytes):
    """Largest TB | BN such that the per-block working set fits and GB >= min(BN, 8)."""
    n_temps = 4                                  # live full-tile f32 intermediates (est.)
    budget = int(vmem_limit_bytes * 0.6)         # headroom for compiler scratch / padding
    min_blocks = min(BN, 8)                      # >=2 parallel blocks (v7x TCs + pipeline)

    def est(tb):
        depth_tile = tb * D * HW
        gt_tile = tb * HW
        return (2 * depth_tile * depth_bytes     # double-buffered depth input
                + 2 * gt_tile * gt_bytes         # double-buffered gt input
                + n_temps * depth_tile * 4       # f32 intermediates
                + gt_tile * 4)                   # small f32 per-pixel temps

    best = 1
    for tb in range(1, BN + 1):
        if BN % tb:
            continue
        if BN // tb < min_blocks:
            break
        if est(tb) <= budget:
            best = tb
    return best


def depth_loss_for_img_bev(depth_gt, depth, grid_config, loss_depth_weight):
    d0, d1, dstep = (float(v) for v in grid_config["dbound"])
    D = int(np.arange(d0, d1, dstep).shape[0])   # == len(torch.arange(*dbound))

    B, N, H, W = depth_gt.shape
    BN, HW = B * N, H * W

    # gt is tiny (1/D of the depth bytes): cast to f32 up front so mask / bin index are
    # never computed on reduced-precision values.  The big depth tensor keeps its native
    # dtype (bf16 streams at half the HBM bytes); the kernel casts to f32 after load.
    gt = depth_gt.reshape(BN, 1, HW).astype(jnp.float32)
    dep = depth.reshape(BN, D, HW)

    vmem_limit = _vmem_limit_bytes()
    TB = _choose_tb(BN, D, HW, jnp.dtype(dep.dtype).itemsize, 4, vmem_limit)
    GB = BN // TB

    kernel = functools.partial(_depth_bce_kernel, d0=d0, dstep=dstep, D=D)

    partials = pl.pallas_call(
        kernel,
        out_shape=jax.ShapeDtypeStruct((GB, 1, 128), jnp.float32),
        grid=(GB,),
        in_specs=[
            # Full-extent last two dims (1|D, HW) are exempt from the (8,128) rule,
            # so no padding / copying of the inputs is ever needed.
            pl.BlockSpec((TB, 1, HW), lambda bi: (bi, 0, 0)),
            pl.BlockSpec((TB, D, HW), lambda bi: (bi, 0, 0)),
        ],
        # Lane-dense 128-wide partial-sum row per block -> unmasked stores.
        out_specs=pl.BlockSpec((1, 1, 128), lambda bi: (bi, 0, 0)),
        compiler_params=pltpu.CompilerParams(
            dimension_semantics=("parallel",),
            vmem_limit_bytes=vmem_limit,
        ),
    )(gt, dep)

    # Tiny final reduction + normalization.
    total = jnp.sum(partials)
    mean = total / float(BN * D * HW)
    return jnp.asarray(loss_depth_weight, jnp.float32) * mean


def _reference_loss(depth_gt, depth, grid_config, loss_depth_weight):
    """Pure-JAX reference mirroring the PyTorch forward (sigmoid + clamped logs)."""
    d0, d1, dstep = (float(v) for v in grid_config["dbound"])
    D = int(np.arange(d0, d1, dstep).shape[0])
    B, N, H, W = depth_gt.shape
    w = (depth_gt != 0).astype(jnp.float32)[:, :, None, :, :]           # (B,N,1,H,W)
    idx = jnp.clip(jnp.floor((depth_gt - d0) / dstep), 0, D).astype(jnp.int32)
    onehot = jax.nn.one_hot(idx, D, dtype=jnp.float32)                  # (B,N,H,W,D)
    t = jnp.transpose(onehot, (0, 1, 4, 2, 3))                          # (B,N,D,H,W)
    p = jax.nn.sigmoid(depth.reshape(B, N, D, H, W).astype(jnp.float32))
    bce = -(t * jnp.maximum(jnp.log(p), -100.0)
            + (1.0 - t) * jnp.maximum(jnp.log(1.0 - p), -100.0))
    return loss_depth_weight * jnp.mean(w * bce)


def _run_case(key, B, N, H, W, grid_config, loss_depth_weight):
    D = int(np.arange(*grid_config["dbound"]).shape[0])
    k_gt, k_mask, k_depth = jax.random.split(key, 3)

    # Ground-truth depths in [0.5, 4.5) with ~25% invalid (zero) pixels.
    depth_gt = jax.random.uniform(k_gt, (B, N, H, W), minval=0.5, maxval=4.5)
    valid = jax.random.uniform(k_mask, (B, N, H, W)) > 0.25
    depth_gt = jnp.where(valid, depth_gt, 0.0).astype(jnp.float32)

    # Predicted depth logits, shape (B*N, D, H, W) as fed to the module.
    depth = jax.random.normal(k_depth, (B * N, D, H, W), dtype=jnp.float32)

    loss = jax.block_until_ready(
        depth_loss_for_img_bev(depth_gt, depth, grid_config, loss_depth_weight))
    ref = jax.block_until_ready(
        _reference_loss(depth_gt, depth, grid_config, loss_depth_weight))
    np.testing.assert_allclose(np.asarray(loss), np.asarray(ref), rtol=2e-5, atol=1e-6)


if __name__ == "__main__":
    # Module "parameters" (hyperparameters; no learnable weights in this module).
    grid_config = {"dbound": (1.0, 5.0, 0.5)}   # -> D = 8 depth bins
    loss_depth_weight = 3.0

    key = jax.random.PRNGKey(0)
    k1, k2 = jax.random.split(key)

    # Lane-aligned spatial extent (HW = 256).
    _run_case(k1, B=2, N=2, H=16, W=16, grid_config=grid_config,
              loss_depth_weight=loss_depth_weight)
    # Ragged spatial extent (HW = 192, not a multiple of 128) — exercises the
    # pad-free full-extent-lane path.
    _run_case(k2, B=2, N=2, H=16, W=12, grid_config=grid_config,
              loss_depth_weight=loss_depth_weight)

    print("KERNEL_OK")
</pallas_src>

<mosaic_0001>
module attributes {stable_mosaic.version = 11 : i64} {
  func.func @_depth_bce_kernel(%arg0: i32, %arg1: memref<1x1x256xf32, #tpu.memory_space<vmem>>, %arg2: memref<1x8x256xf32, #tpu.memory_space<vmem>>, %arg3: memref<1x1x128xf32, #tpu.memory_space<vmem>>) attributes {dimension_semantics = [#tpu.dimension_semantics<parallel>], iteration_bounds = array<i64: 4>, scalar_prefetch = 0 : i64, scratch_operands = 0 : i64, tpu.core_type = #tpu.core_type<tc>, window_params = [{transform_indices = @transform_0, window_bounds = array<i64: 1, 1, 256>}, {transform_indices = @transform_1, window_bounds = array<i64: 1, 8, 256>}, {transform_indices = @transform_2, window_bounds = array<i64: 1, 1, 128>}]} {
    %c0 = arith.constant 0 : index
    %c0_0 = arith.constant 0 : index
    %c0_1 = arith.constant 0 : index
    %0 = vector.load %arg1[%c0, %c0_0, %c0_1] : memref<1x1x256xf32, #tpu.memory_space<vmem>>, vector<1x1x256xf32>
    %c0_2 = arith.constant 0 : index
    %c0_3 = arith.constant 0 : index
    %c0_4 = arith.constant 0 : index
    %1 = vector.load %arg2[%c0_2, %c0_3, %c0_4] : memref<1x8x256xf32, #tpu.memory_space<vmem>>, vector<1x8x256xf32>
    %cst = arith.constant 1.000000e+00 : f32
    %2 = vector.broadcast %cst : f32 to vector<1x1x256xf32>
    %3 = arith.subf %0, %2 : vector<1x1x256xf32>
    %cst_5 = arith.constant 5.000000e-01 : f32
    %4 = vector.broadcast %cst_5 : f32 to vector<1x1x256xf32>
    %5 = arith.divf %3, %4 : vector<1x1x256xf32>
    %6 = math.floor %5 : vector<1x1x256xf32>
    %cst_6 = arith.constant 0.000000e+00 : f32
    %cst_7 = arith.constant 8.000000e+00 : f32
    %7 = vector.broadcast %cst_6 : f32 to vector<1x1x256xf32>
    %8 = arith.maximumf %7, %6 : vector<1x1x256xf32>
    %9 = vector.broadcast %cst_7 : f32 to vector<1x1x256xf32>
    %10 = arith.minimumf %9, %8 : vector<1x1x256xf32>
    %11 = arith.fptosi %10 : vector<1x1x256xf32> to vector<1x1x256xi32>
    %cst_8 = arith.constant 0.000000e+00 : f32
    %12 = vector.broadcast %cst_8 : f32 to vector<1x1x256xf32>
    %13 = arith.cmpf one, %0, %12 : vector<1x1x256xf32>
    %14 = arith.extui %13 : vector<1x1x256xi1> to vector<1x1x256xi32>
    %15 = arith.sitofp %14 : vector<1x1x256xi32> to vector<1x1x256xf32>
    %16 = tpu.iota {dimensions = array<i32: 1>} : vector<1x8x1xi32>
    %17 = vector.broadcast %16 : vector<1x8x1xi32> to vector<1x8x256xi32>
    %18 = vector.broadcast %11 : vector<1x1x256xi32> to vector<1x8x256xi32>
    %19 = arith.cmpi eq, %17, %18 : vector<1x8x256xi32>
    %cst_9 = arith.constant 0.000000e+00 : f32
    %20 = vector.broadcast %cst_9 : f32 to vector<1x8x256xf32>
    %21 = arith.maximumf %1, %20 : vector<1x8x256xf32>
    %22 = math.absf %1 : vector<1x8x256xf32>
    %cst_10 = arith.constant 0.000000e+00 : f32
    %23 = vector.broadcast %cst_10 : f32 to vector<1x8x256xf32>
    %24 = arith.subf %23, %22 : vector<1x8x256xf32>
    %25 = math.exp %24 : vector<1x8x256xf32>
    %26 = math.log1p %25 : vector<1x8x256xf32>
    %27 = arith.addf %21, %26 : vector<1x8x256xf32>
    %cst_11 = arith.constant 0.000000e+00 : f32
    %28 = vector.broadcast %cst_11 : f32 to vector<1x8x256xf32>
    %29 = arith.select %19, %1, %28 : vector<1x8x256xi1>, vector<1x8x256xf32>
    %30 = arith.subf %27, %29 : vector<1x8x256xf32>
    %cst_12 = arith.constant 1.000000e+02 : f32
    %31 = vector.broadcast %cst_12 : f32 to vector<1x8x256xf32>
    %32 = arith.minimumf %30, %31 : vector<1x8x256xf32>
    %cst_13 = arith.constant dense<0.000000e+00> : vector<1x256xf32>
    %33 = vector.multi_reduction <add>, %32, %cst_13 [1] : vector<1x8x256xf32> to vector<1x256xf32>
    %34 = vector.shape_cast %33 : vector<1x256xf32> to vector<1x1x256xf32>
    %35 = arith.mulf %15, %34 : vector<1x1x256xf32>
    %36 = vector.shape_cast %35 : vector<1x1x256xf32> to vector<1x1x1x256xf32>
    %cst_14 = arith.constant dense<0.000000e+00> : vector<1xf32>
    %37 = vector.multi_reduction <add>, %36, %cst_14 [1, 2, 3] : vector<1x1x1x256xf32> to vector<1xf32>
    %38 = vector.shape_cast %37 : vector<1xf32> to vector<1x1x1x1xf32>
    %39 = vector.extract %38[0, 0, 0, 0] : f32 from vector<1x1x1x1xf32>
    %40 = tpu.iota {dimensions = array<i32: 2>} : vector<1x1x128xi32>
    %c0_i32 = arith.constant 0 : i32
    %41 = vector.broadcast %c0_i32 : i32 to vector<1x1x128xi32>
    %42 = arith.cmpi eq, %40, %41 : vector<1x1x128xi32>
    %cst_15 = arith.constant 0.000000e+00 : f32
    %43 = vector.broadcast %39 : f32 to vector<1x1x128xf32>
    %44 = vector.broadcast %cst_15 : f32 to vector<1x1x128xf32>
    %45 = arith.select %42, %43, %44 : vector<1x1x128xi1>, vector<1x1x128xf32>
    %c0_16 = arith.constant 0 : index
    %c0_17 = arith.constant 0 : index
    %c0_18 = arith.constant 0 : index
    %46 = vector.load %arg3[%c0_16, %c0_17, %c0_18] : memref<1x1x128xf32, #tpu.memory_space<vmem>>, vector<1x1x128xf32>
    tpu.vector_store %arg3[%c0_16, %c0_17, %c0_18], %45 {strides = array<i32>} : memref<1x1x128xf32, #tpu.memory_space<vmem>>, vector<1x1x128xf32>,
    return
  }
  func.func @transform_0(%arg0: i32) -> (i32, i32, i32) {
    %c0_i32 = arith.constant 0 : i32
    %c0_i32_0 = arith.constant 0 : i32
    %c0_i32_1 = arith.constant 0 : i32
    return %arg0, %c0_i32, %c0_i32_0 : i32, i32, i32
  }
  func.func @transform_1(%arg0: i32) -> (i32, i32, i32) {
    %c0_i32 = arith.constant 0 : i32
    %c0_i32_0 = arith.constant 0 : i32
    %c0_i32_1 = arith.constant 0 : i32
    return %arg0, %c0_i32, %c0_i32_0 : i32, i32, i32
  }
  func.func @transform_2(%arg0: i32) -> (i32, i32, i32) {
    %c0_i32 = arith.constant 0 : i32
    %c0_i32_0 = arith.constant 0 : i32
    %c0_i32_1 = arith.constant 0 : i32
    return %arg0, %c0_i32, %c0_i32_0 : i32, i32, i32
  }
}

</mosaic_0001>

<bundles_post_ra>
// kernel: tpu_custom_call.1
= control target key start
LH: loop header
LB: loop body
LE: loop exit
PB: predicated region body
PF: predicated region fallthrough
CT: control target
= control target key end

     0   :  { %7 = vsyncpa [#allocation3], 0  ;;  %s873_s0 = inlined_call_operand.hbm [shape: f32[4,1,256], index: 0, kind: input, shape index: {}]   ;;  %s874_s1 = inlined_call_operand.hbm [shape: f32[4,8,256], index: 1, kind: input, shape index: {}]   ;;  %s875_s2 = inlined_call_operand.hbm [shape: f32[4,1,128], index: 2, kind: output, shape index: {}]  }
   0x1   :  { %9 = vsyncpa [#allocation3 + $0x1], 0 }
   0x2   :  { %10 = vsyncpa [#allocation6], 0 }
   0x3   :  { %12 = vsyncpa [#allocation6 + $0x1], 0 }
   0x4   :  { %13 = vsyncpa [#allocation4], 0 }
   0x5   :  { %15 = vsyncpa [#allocation4 + $0x1], 0  ;;  %s657_s9 = smov 0   ;;  %s659_s10 = smov 0  }
   0x6   :  { %s661_s11 = smov 0   ;;  %s663_s12 = smov 0  }
   0x7 LB: > { %s678_s13 = sadd.s32 4294967295, %s635_s12   ;;  %s421_s14 = sadd.s32 4294967294, %s635_s12   ;;  %s635_s12 = sphi %s663_s12, %s893_s12   ;;  %s631_s11 = sphi %s661_s11, %s892_s11   ;;  %s627_s10 = sphi %s659_s10, %s891_s10   ;;  %s623_s9 = sphi %s657_s9, %s890_s9  }
   0x8   : > { %s682_s15 = sadd.s32 1, %s635_s12   ;;  %s28_s16 = sadd.s32 1, %s631_s11 }
   0x9   : > { %s25_s17 = ssub.s32 %s635_s12, %s682_s15  ;;  %p35_p0 = scmp.ne.s32.totalorder %s631_s11, %s627_s10 }
   0xa   : > { %p26_p1 = scmp.eq.s32.totalorder %s25_s17, 0  ;;  %p36_p2 = scmp.eq.s32.totalorder %s635_s12, 0 }
   0xb   : > { %p41_p3 = scmp.ne.s32.totalorder %s627_s10, %s623_s9  ;;  %p42_p4 = scmp.eq.s32.totalorder %s678_s13, 0 }
   0xc   : > { %s694_s18 = scalar_select %p26_p1, %s631_s11, %s28_s16  }
   0xd   : > { %p696_p5 = por %p36_p2, %p35_p0  ;;  %p700_p6 = por %p42_p4, %p41_p3 }
   0xe   : > { %p91_p7 = scmp.eq.s32.totalorder %s678_s13, 3  ;;  %p97_p8 = scmp.eq.s32.totalorder %s421_s14, 3 }
   0xf   : > { %s879_s20 = scalar_select %p700_p6, 1, 0 }
  0x10   : > { %p461_p9 = scmp.lt.s32.totalorder %s635_s12, 4  ;;  %p706_p10 = por %p91_p7, %p35_p0 }
  0x11   : > { %p710_p11 = por %p97_p8, %p41_p3  ;;  %s715_s23 = sand.u32 1, %s631_s11  }
  0x12   : > { %s880_s21 = scalar_select %p706_p10, 1, 0 }
  0x13   : > { %s881_s22 = scalar_select %p710_p11, 1, 0 }
  0x14   : > { %s438_s24 = sshll.u32 %s635_s12, 5  ;;  %s424_s25 = sshll.u32 %s715_s23, 1 }
  0x15   : > { %s722_s28 = scalar_lea.hbm %s873_s0, %s438_s24  ;;  %s121_s29 = scalar_lea.vmem [#allocation2], %s424_s25 }
  0x16   : > { %s129_s30 = sshll.u32 %s121_s29, 4  ;;  %p726_p12 = pnand %p461_p9, %p696_p5  ;;  %s730_s30 = int_to_ptr.vmem [resolvable:$true] %s129_s30 }
  0x17   : > { %s118_s4 = scalar_lea.sflag [#allocation3], %s715_s23  ;;  %s505_s5 = scalar_lea.hbm %s722_s28, 32 }
  0x18   : > { %p506_p1 = scmp.ne.s32.totalorder %s722_s28, %s505_s5  ;;  %p507_p2 = pneg %p726_p12 }
  0x19   : > { %s510_s8 = scalar_lea.hbm %s873_s0, 128  ;;  %p511_p5 = scmp.lt.u32.totalorder %s722_s28, %s873_s0 }
  0x1a   : > { %p508_p3 = pnand %p507_p2, %p506_p1  ;;  %p512_p7 = scmp.lt.u32.totalorder %s510_s8, %s505_s5 }
  0x1b   : > { %p514_p9 = scmp.lt.u32.totalorder %s505_s5, %s722_s28 }
  0x1c   : > { %p509_p4 = pneg %p508_p3  ;;  %p513_p8 = por %p512_p7, %p511_p5 }
  0x1e   : > { %p515_p13 = por %p514_p9, %p513_p8 }
  0x20   : > { %p516_p0 = pnand %p515_p13, %p509_p4 }
  0x22   : > { %519 = shalt.err (!%p516_p0)
}
  0x23   : > { %s520_s17 = scalar_lea.vmem %s730_s30, 32  ;;  %s637_s19 = smov [#allocation2]  }
  0x24   : > { %p521_p1 = scmp.ne.s32.totalorder %s730_s30, %s520_s17  ;;  %s525_s24 = sshll.u32 %s637_s19, 4  ;;  %s526_s24 = int_to_ptr.vmem [resolvable:$false] %s525_s24 }
  0x25   : > { %s527_s25 = scalar_lea.vmem %s526_s24, 64  ;;  %p528_p10 = scmp.lt.s32.totalorder %s730_s30, %s526_s24 }
  0x26   : > { %p523_p3 = pnand %p521_p1, %p507_p2  ;;  %p529_p5 = scmp.lt.s32.totalorder %s527_s25, %s520_s17 }
  0x28   : > { %p524_p11 = pneg %p523_p3  ;;  %p530_p7 = por %p529_p5, %p528_p10 }
  0x2a   : > { %p531_p8 = pnand %p530_p7, %p524_p11 }
  0x2c   : > { %534 = shalt.err (!%p531_p8)
}
  0x2d   : > { %453 = dma.hbm_to_vmem [thread:$0]  (!%p726_p12), %s722_s28, 32, %s730_s30, %s118_s4  }
  0x2e   : > { %p883_p13 = scmp.lt.s32.totalorder %s635_s12, 5  ;;  %p884_p0 = scmp.ge.s32.totalorder %s635_s12, 1 }
  0x2f   : > { %s427_s27 = sshll.u32 %s715_s23, 4  ;;  %s439_s29 = sshll.u32 %s635_s12, 8 }
  0x30   : > { %p764_p4 = pnand %p884_p0, %p883_p13  ;;  %s773_s7 = scalar_lea.hbm %s874_s1, %s439_s29 }
  0x31   : > { %s140_s8 = scalar_lea.vmem [#allocation5], %s427_s27  ;;  %s137_s28 = scalar_lea.sflag [#allocation6], %s715_s23 }
  0x32   : > { %s885_s26 = scalar_select %p764_p4, 1, 0 }
  0x33   : > { %s148_s14 = sshll.u32 %s140_s8, 4  ;;  %s535_s30 = scalar_lea.hbm %s773_s7, 256  ;;  %s149_s14 = int_to_ptr.vmem [resolvable:$true] %s148_s14 }
  0x34   : > { %p536_p10 = scmp.ne.s32.totalorder %s773_s7, %s535_s30  ;;  %s540_s17 = scalar_lea.hbm %s874_s1, 1024 }
  0x35   : > { %p541_p1 = scmp.lt.u32.totalorder %s773_s7, %s874_s1  ;;  %p542_p3 = scmp.lt.u32.totalorder %s540_s17, %s535_s30 }
  0x36   : > { %p538_p11 = pnand %p536_p10, %p507_p2  ;;  %p544_p7 = scmp.lt.u32.totalorder %s535_s30, %s773_s7 }
  0x37   : > { %p543_p5 = por %p542_p3, %p541_p1 }
  0x38   : > { %p539_p9 = pneg %p538_p11 }
  0x39   : > { %p545_p8 = por %p544_p7, %p543_p5 }
  0x3b   : > { %p546_p13 = pnand %p545_p8, %p539_p9 }
  0x3d   : > { %549 = shalt.err (!%p546_p13)
}
  0x3e   : > { %s550_s23 = scalar_lea.vmem %s149_s14, 256  ;;  %s638_s25 = smov [#allocation5]  }
  0x3f   : > { %p551_p0 = scmp.ne.s32.totalorder %s149_s14, %s550_s23  ;;  %s555_s27 = sshll.u32 %s638_s25, 4  ;;  %s556_s27 = int_to_ptr.vmem [resolvable:$false] %s555_s27 }
  0x40   : > { %s557_s29 = scalar_lea.vmem %s556_s27, 512  ;;  %p558_p6 = scmp.lt.s32.totalorder %s149_s14, %s556_s27 }
  0x41   : > { %p553_p10 = pnand %p551_p0, %p507_p2  ;;  %p559_p4 = scmp.lt.s32.totalorder %s557_s29, %s550_s23 }
  0x43   : > { %p554_p11 = pneg %p553_p10  ;;  %p560_p1 = por %p559_p4, %p558_p6 }
  0x45   : > { %p561_p3 = pnand %p560_p1, %p554_p11 }
  0x47   : > { %564 = shalt.err (!%p561_p3)
}
  0x48   : > { %456 = dma.hbm_to_vmem [thread:$0]  (!%p726_p12), %s773_s7, 256, %s149_s14, %s137_s28  }
  0x49   : > { %p886_p9 = scmp.ne.s32.totalorder %s885_s26, 0 }
  0x4a   : > { %s798_s5 = sand.u32 (!%p886_p9), 1, %s627_s10   ;;  %p887_p2 = scmp.ne.s32.totalorder (!%p886_p9), %s879_s20, 0 }
  0x4b   : > { %157 = sbr.rel (%p886_p9) target bundleno = 372 (0x174), region = 28  ;;  %s431_s6 = sshll.u32 (!%p886_p9), %s798_s5, 1 }
  0x4c   : > { %s160_s8 = scalar_lea.sflag (!%p886_p9), [#allocation3], %s798_s5  ;;  %s163_s30 = scalar_lea.vmem (!%p886_p9), [#allocation2], %s431_s6 }
  0x52   : > { %610 = dma.done.wait (%p887_p2), %s160_s8, 32  }
  0x53   : > { %612 = vsyncadd (%p887_p2), %s160_s8, 4294967264  ;;  %s432_s3 = sshll.u32 %s798_s5, 4  ;;  %s169_s26 = scalar_lea.sflag [#allocation6], %s798_s5 }
  0x54   : > { %s172_s7 = scalar_lea.vmem [#allocation5], %s432_s3 }
  0x55   : > { %614 = dma.done.wait (%p887_p2), %s169_s26, 256  }
  0x56   : > { %616 = vsyncadd (%p887_p2), %s169_s26, 4294967040  ;;  %v812_v0 = vld [vmem:[%s163_s30] sm:$0x3]  ;;  %v198_v1 = vld [vmem:[%s172_s7] sm:$0xff]  ;;  %v210_v14 = vlaneseq  ;;  %v639_v54 = vmov 1966171168  }
  0x57   : > { %v199_v2 = vld [vmem:[%s172_s7 + $0x8] sm:$0xff]  ;;  %v433_v3 = vadd.f32 -1.0, %v812_v0  ;;  %v224_v4 = vand.u32 2147483647, %v198_v1  ;;  %v222_v34 = vmax.f32 %v198_v1, 0.0  ;;  %v274_v55 = vunpack.c.l.s4 %v639_v54  ;;  %s435_s20 = sshll.u32 %s678_s13, 4 }
  0x58   : > { %v225_v5 = vand.u32 2147483647, %v199_v2  ;;  %v816_v18 = vshrl.u32 %v210_v14, 7  ;;  %v223_v37 = vmax.f32 %v199_v2, 0.0  ;;  %vm207_vm4 = vcmp.ne.f32.partialorder %v812_v0, 0.0  ;;  %s196_s14 = scalar_lea.vmem [#allocation7], %s798_s5  ;;  %s830_s19 = scalar_lea.hbm %s875_s2, %s435_s20 }
  0x59   : > { %v202_v6 = vmul.f32 2.0, %v433_v3  ;;  %v226_v7 = vsub.f32 0.0, %v224_v4  ;;  %v275_v60 = vunpack.c.0.s8 %v274_v55  ;;  %vm300_vm5 = vcmask 1040384   ;;  %s332_s28 = sshll.u32 %s196_s14, 4  ;;  %s320_s24 = scalar_lea.sflag [#allocation4], %s798_s5  ;;  %s832_s28 = int_to_ptr.vmem [resolvable:$true] %s332_s28 }
  0x5a   : > { %v227_v8 = vsub.f32 0.0, %v225_v5  ;;  %v214_v23 = vsub.s32 0, %v816_v18  ;;  %v218_v25 = vsub.s32 1, %v816_v18  ;;  %v640_v5 = vmov 0.0   ;;  %s565_s23 = scalar_lea.vmem %s832_s28, 16  ;;  %p888_p12 = scmp.ne.s32.totalorder %s880_s21, 0 }
  0x5b   : > { %v228_v9 = vmul.f32 1.442695, %v226_v7  ;;  %v203_v11 = vfloor.f32 %v202_v6  ;;  %v434_v6 = vsel %vm207_vm4, 1.0, %v640_v5  ;;  %p566_p6 = scmp.ne.s32.totalorder %s832_s28, %s565_s23  ;;  %s641_s13 = smov [#allocation7]  }
  0x5c   : > { %v230_v10 = vmul.f32 1.442695, %v227_v8  ;;  %s569_s25 = sshll.u32 %s641_s13, 4  ;;  %s570_s25 = int_to_ptr.vmem [resolvable:$false] %s569_s25 }
  0x5d   : > { %497 = vpow2.f32 %v228_v9  ;;  %v204_v12 = vmax.f32 %v203_v11, 0.0  ;;  %p567_p4 = pnand %p566_p6, %p888_p12  ;;  %s571_s27 = scalar_lea.vmem %s570_s25, 32 }
  0x5e   : > { %499 = vpow2.f32 %v230_v10  ;;  %p572_p7 = scmp.lt.s32.totalorder %s832_s28, %s570_s25  ;;  %p573_p8 = scmp.lt.s32.totalorder %s571_s27, %s565_s23 }
  0x5f   : > { %v205_v13 = vmin.f32 %v204_v12, 8.0  ;;  %p568_p5 = pneg %p567_p4 }
  0x60   : > { %p574_p13 = por %p573_p8, %p572_p7 }
  0x61   : > { %v440_v17 = vtrunc.f32 %v205_v13 }
  0x62   : > { %p575_p0 = pnand %p574_p13, %p568_p5 }
  0x63   : > { %v441_v22 = vcvt.f32.s32 %v440_v17 }
  0x65   : > { %v215_v27 = vrot.slane %v441_v22, %v214_v23  ;;  %v219_v30 = vrot.slane %v441_v22, %v218_v25 }
  0x67   : > { %v498_v15 = vpop.eup %497  ;;  %vm220_vm0 = vcmp.eq.s32.totalorder %v816_v18, %v215_v27  ;;  %vm221_vm2 = vcmp.eq.s32.totalorder %v816_v18, %v219_v30 }
  0x68   : > { %v500_v16 = vpop.eup %499  ;;  %v232_v19 = vadd.f32 1.0, %v498_v15  ;;  %v235_v21 = vmul.f32 -0.5, %v498_v15  ;;  %v238_v28 = vand.u32 2147483647, %v498_v15  ;;  %v252_v41 = vsel %vm220_vm0, %v198_v1, 0.0 }
  0x69   : > { %v241_v20 = vadd.f32 1.0, %v500_v16  ;;  %v244_v24 = vmul.f32 -0.5, %v500_v16  ;;  %v247_v31 = vand.u32 2147483647, %v500_v16  ;;  %v253_v44 = vsel %vm221_vm2, %v199_v2, 0.0 }
  0x6a   : > { %501 = vlog2.f32 %v232_v19  ;;  %v236_v26 = vadd.f32 1.0, %v235_v21  ;;  %vm239_vm1 = vcmp.lt.f32.partialorder %v238_v28, 0.0004427343  ;;  %v278_v2 = vsub.s32 %v275_v60, %v816_v18 }
  0x6b   : > { %503 = vlog2.f32 %v241_v20  ;;  %v245_v29 = vadd.f32 1.0, %v244_v24  ;;  %vm248_vm3 = vcmp.lt.f32.partialorder %v247_v31, 0.0004427343  ;;  %v314_v21 = vand.u32 127, %v210_v14 }
  0x6c   : > { %v237_v32 = vmul.f32 %v498_v15, %v236_v26 }
  0x6d   : > { %v246_v35 = vmul.f32 %v500_v16, %v245_v29  ;;  %vm315_vm6 = vcmp.eq.s32.totalorder %v314_v21, 0 }
  0x74   : > { %v502_v33 = vpop.eup %501 }
  0x75   : > { %v504_v36 = vpop.eup %503  ;;  %v234_v38 = vmul.f32 0.6931472, %v502_v33 }
  0x76   : > { %v243_v39 = vmul.f32 0.6931472, %v504_v36 }
  0x77   : > { %v240_v40 = vsel %vm239_vm1, %v237_v32, %v234_v38 }
  0x78   : > { %v249_v42 = vsel %vm248_vm3, %v246_v35, %v243_v39  ;;  %v250_v43 = vadd.f32 %v240_v40, %v222_v34 }
  0x79   : > { %v251_v45 = vadd.f32 %v249_v42, %v223_v37 }
  0x7a   : > { %v254_v46 = vsub.f32 %v250_v43, %v252_v41 }
  0x7b   : > { %v255_v47 = vsub.f32 %v251_v45, %v253_v44 }
  0x7c   : > { %v256_v48 = vmin.f32 %v254_v46, 100.0 }
  0x7d   : > { %v257_v49 = vmin.f32 %v255_v47, 100.0 }
  0x7e   : > { %v258_v50 = vrot.slane %v256_v48, 4 }
  0x7f   : > { %v264_v51 = vrot.slane %v257_v49, 4 }
  0x80   : > { %v259_v52 = vadd.f32 %v258_v50, %v256_v48 }
  0x81   : > { %v265_v53 = vadd.f32 %v264_v51, %v257_v49 }
  0x82   : > { %v260_v56 = vrot.slane %v259_v52, 2 }
  0x83   : > { %v266_v57 = vrot.slane %v265_v53, 2 }
  0x84   : > { %v261_v58 = vadd.f32 %v260_v56, %v259_v52 }
  0x85   : > { %v267_v59 = vadd.f32 %v266_v57, %v265_v53 }
  0x86   : > { %v262_v61 = vrot.slane %v261_v58, 1 }
  0x87   : > { %v268_v62 = vrot.slane %v267_v59, 1 }
  0x88   : > { %v263_v63 = vadd.f32 %v262_v61, %v261_v58 }
  0x89   : > { %v269_v1 = vadd.f32 %v268_v62, %v267_v59 }
  0x8b   : > { %v272_v3 = vcombine.low %v263_v63, %v269_v1 }
  0x8d   : > { %v279_v4 = vrot.slane %v272_v3, %v278_v2 }
  0x8f   : > { %v286_v7 = vrot.slane %v279_v4, %v278_v2 }
  0x91   : > { %v288_v8 = vmul.f32 %v434_v6, %v286_v7 }
  0x93   : > { %v293_v9 = vrot.slane %v288_v8, %v214_v23  ;;  %v297_v10 = vrot.slane %v288_v8, %v218_v25 }
  0x95   : > { %v301_v11 = vsel %vm300_vm5, %v293_v9, 0.0  ;;  %v302_v12 = vsel %vm300_vm5, %v297_v10, 0.0 }
  0x96   : > { %v303_v13 = vadd.f32 %v302_v12, %v301_v11 }
  0x98   : > { %304 = vadd.xlane.f32.xlu0 %v303_v13 }
 0x125   : > { %v305_v15 = vpop.xlane.xlu0 %304 }
 0x126   : > { %v306_v16 = vrot.slane %v305_v15, 4 }
 0x128   : > { %v307_v17 = vadd.f32 %v306_v16, %v305_v15 }
 0x12a   : > { %v308_v18 = vrot.slane %v307_v17, 2 }
 0x12c   : > { %v309_v0 = vadd.f32 %v308_v18, %v307_v17 }
 0x12e   : > { %v310_v19 = vrot.slane %v309_v0, 1 }
 0x130   : > { %v311_v20 = vadd.f32 %v310_v19, %v309_v0 }
 0x132   : > { %442 = vpush %v311_v20 }
 0x163   : > { %s443_s4 = spop %442 }
 0x164   : > { %v316_v22 = vstv %s443_s4 }
 0x165   : > { %v317_v23 = vsel %vm315_vm6, %v316_v22, 0.0 }
 0x166   : > { %318 = vst [vmem:[%s196_s14] sm:$0x1] %v317_v23 }
 0x167   : > { %578 = shalt.err (!%p575_p0)
}
 0x168   : > { %s579_s29 = scalar_lea.hbm %s830_s19, 16  ;;  %s583_s8 = scalar_lea.hbm %s875_s2, 64 }
 0x169   : > { %p580_p10 = scmp.ne.s32.totalorder %s830_s19, %s579_s29  ;;  %p584_p3 = scmp.lt.u32.totalorder %s830_s19, %s875_s2 }
 0x16a   : > { %p585_p9 = scmp.lt.u32.totalorder %s583_s8, %s579_s29  ;;  %p587_p6 = scmp.lt.u32.totalorder %s579_s29, %s830_s19 }
 0x16b   : > { %p581_p11 = pnand %p580_p10, %p888_p12 }
 0x16c   : > { %p586_p2 = por %p585_p9, %p584_p3 }
 0x16d   : > { %p582_p1 = pneg %p581_p11 }
 0x16e   : > { %p588_p4 = por %p587_p6, %p586_p2 }
 0x170   : > { %p589_p5 = pnand %p588_p4, %p582_p1 }
 0x172   : > { %592 = shalt.err (!%p589_p5)
}
 0x173   : > { %448 = dma.vmem_to_hbm [thread:$0]  (%p888_p12), %s832_s28, 16, %s830_s19, %s320_s24  }
 0x174 PF: > { %p462_p7 = scmp.ge.s32.totalorder %s635_s12, 2  ;;  %s344_s26 = sand.u32 1, %s623_s9  }
 0x175   : > { %p889_p8 = scmp.ne.s32.totalorder %s881_s22, 0  ;;  %s345_s7 = scalar_lea.sflag [#allocation4], %s344_s26 }
 0x177   : > { %p458_p13 = pnand %p462_p7, %p889_p8 }
 0x179   : > { %618 = dma.done.wait (!%p458_p13), %s345_s7, 16  }
 0x17a   : > { %620 = vsyncadd (!%p458_p13), %s345_s7, 4294967280  ;;  %p18_p0 = scmp.ge.s32.totalorder %s682_s15, 6   ;;  %s890_s9 = smov %s627_s10 }
 0x17b   : > { %s891_s10 = smov %s631_s11  ;;  %s892_s11 = smov %s694_s18 }
 0x17c   : > { %s893_s12 = smov %s682_s15  ;;  %20 = sbr.rel (!%p18_p0) target bundleno = 7 (0x7), region = 86 }
 0x183   :  { %349 = vsyncpa [#allocation3], 1 }
 0x184   :  { %351 = vsyncpa [#allocation3 + $0x1], 1 }
 0x185   :  { %352 = vsyncpa [#allocation6], 1 }
 0x186   :  { %354 = vsyncpa [#allocation6 + $0x1], 1 }
 0x187   :  { %355 = vsyncpa [#allocation4], 1 }
 0x188   :  { %357 = vsyncpa [#allocation4 + $0x1], 1 }

</bundles_post_ra>
